<compile_context>
chip_gen: v6e
topology: v6e:2x2x1
jax: 0.10.0
libtpu: 0.0.40
codegen_flags: <defaults>
</compile_context>

<pallas_src>
import functools

import jax
import jax.numpy as jnp
from jax.experimental import pallas as pl
from jax.experimental.pallas import tpu as pltpu

_VMEM_BUDGET_BYTES = 40 * 1024 * 1024   # conservative vs v7x's 64 MiB physical VMEM


def _round_up(x, m):
    return ((x + m - 1) // m) * m


def _num_tensorcores():
    """v7x has 2 TensorCores per chip; v5e/v6e have 1 (safe default)."""
    try:
        kind = (jax.devices()[0].device_kind or "").lower()
    except Exception:
        return 1
    return 2 if "v7" in kind else 1


def gru_fc_kernel(x_ref, w_ref, bg_ref, bhn_ref, fcw_ref, fcb_ref, o_ref, *, hidden_pad):
    """One batch tile of: single-step GRU (h0 == 0) fused with the FC head."""
    Hp = hidden_pad
    # Matmul inputs in the (possibly bf16) weight dtype; f32 accumulation on the MXU.
    x = x_ref[...].astype(w_ref.dtype)                                              # (TB, Ip)
    g = jnp.dot(x, w_ref[...], preferred_element_type=jnp.float32) + bg_ref[...]    # (TB, 3*Hp) f32
    # Lane-aligned gate blocks (Hp is a multiple of 128 lanes).
    # sigmoid(v) == 0.5*tanh(0.5*v) + 0.5 -> one EUP push per gate instead of exp+recip.
    r = 0.5 * jnp.tanh(0.5 * g[:, 0:Hp]) + 0.5
    z = 0.5 * jnp.tanh(0.5 * g[:, Hp:2 * Hp]) + 0.5
    n = jnp.tanh(g[:, 2 * Hp:3 * Hp] + r * bhn_ref[...])
    h = n - z * n                                                                   # == (1-z)*n + z*0
    out = jnp.dot(h.astype(fcw_ref.dtype), fcw_ref[...],
                  preferred_element_type=jnp.float32) + fcb_ref[...]
    o_ref[...] = out.astype(o_ref.dtype)                                            # (TB, Op)


def prepare_kernel_params(params, *, weight_dtype=jnp.bfloat16):
    """Repack PyTorch-layout GRU/Linear params into lane-aligned kernel operands."""
    H = params["w_hh"].shape[1]
    I = params["w_ih"].shape[1]
    O = params["fc_w"].shape[0]
    Hp = _round_up(H, 128)          # lane-aligned gate slices
    Op = _round_up(O, 128)          # lane-dense output store
    Ip = _round_up(I, 8)            # sublane-aligned K dim only (don't blow up x traffic)

    w_ir, w_iz, w_in = jnp.split(params["w_ih"], 3, axis=0)          # each (H, I)
    b_ir, b_iz, b_in = jnp.split(params["b_ih"], 3)
    b_hr, b_hz, b_hn = jnp.split(params["b_hh"], 3)

    pad_w = lambda w: jnp.pad(w.T, ((0, Ip - I), (0, Hp - H)))        # (H, I) -> (Ip, Hp)
    pad_vec = lambda b: jnp.pad(b, (0, Hp - H))

    w_gates = jnp.concatenate([pad_w(w_ir), pad_w(w_iz), pad_w(w_in)], axis=1)      # (Ip, 3*Hp)
    # h0 == 0: gh == b_hh, so the r/z hidden biases fold into the input-gate bias; only
    # the n-gate hidden bias stays separate (it is scaled by r inside the kernel).
    b_gates = jnp.concatenate(
        [pad_vec(b_ir + b_hr), pad_vec(b_iz + b_hz), pad_vec(b_in)])[None, :]        # (1, 3*Hp)
    b_hn_p = pad_vec(b_hn)[None, :]                                                  # (1, Hp)

    fc_w = jnp.pad(params["fc_w"].T, ((0, Hp - H), (0, Op - O)))                     # (Hp, Op)
    fc_b = jnp.pad(params["fc_b"], (0, Op - O))[None, :]                             # (1, Op)

    return {"w": w_gates.astype(weight_dtype), "bg": b_gates.astype(jnp.float32),
            "bhn": b_hn_p.astype(jnp.float32), "fcw": fc_w.astype(weight_dtype),
            "fcb": fc_b.astype(jnp.float32), "Hp": Hp, "Op": Op, "Ip": Ip}


def _vmem_bytes_estimate(TB, Ip, Hp, Op, wbytes, single_buffer_weights):
    """Rough per-core VMEM footprint: BlockSpec buffers + live f32 intermediates."""
    nbuf = 1 if single_buffer_weights else 2
    resident = nbuf * (Ip * 3 * Hp * wbytes + 3 * Hp * 4 + Hp * 4
                       + Hp * Op * wbytes + Op * 4)
    streamed = 2 * TB * Ip * 4 + 2 * TB * Op * 4                # double-buffered x / out
    live = TB * 3 * Hp * 4 + 3 * TB * Hp * 4 + TB * Op * 4      # g, gate maps, fc result
    if wbytes < 4:
        live += TB * (Ip + Hp) * wbytes                         # bf16 casts of x and h
    return resident + streamed + live


def _choose_batch_tiling(B, Ip, Hp, Op, wbytes, batch_tile):
    B8 = _round_up(B, 8)
    TB = min(_round_up(max(batch_tile, 8), 8), B8)              # always a multiple of 8
    # Shrink the tile until the VMEM footprint fits (matters for large hidden sizes,
    # especially against v7x's 64 MiB physical VMEM).
    while TB > 8 and _vmem_bytes_estimate(TB, Ip, Hp, Op, wbytes, True) > _VMEM_BUDGET_BYTES:
        TB = max(8, _round_up(TB // 2, 8))
    # Ensure the "parallel" batch grid has >= num_tensorcores steps (v7x megacore) and
    # equalize tile sizes so a ragged last tile is small instead of almost-empty.
    ntiles = max(pl.cdiv(B8, TB), min(_num_tensorcores(), B8 // 8))
    TB = _round_up(pl.cdiv(B8, ntiles), 8)
    return TB, ntiles, ntiles * TB


def gru_forward(x, params, *, batch_tile=256, weight_dtype=jnp.bfloat16):
    """x: (batch, input_size) float32 -> (batch, output_size) float32."""
    B, I = x.shape
    O = params["fc_w"].shape[0]
    kp = prepare_kernel_params(params, weight_dtype=weight_dtype)
    Hp, Op, Ip = kp["Hp"], kp["Op"], kp["Ip"]
    wbytes = jnp.dtype(weight_dtype).itemsize

    TB, ntiles, Bp = _choose_batch_tiling(B, Ip, Hp, Op, wbytes, batch_tile)
    xp = jnp.pad(x, ((0, Bp - B), (0, Ip - I)))

    kernel = functools.partial(gru_fc_kernel, hidden_pad=Hp)
    cost = pl.CostEstimate(
        flops=2 * Bp * Ip * 3 * Hp + 2 * Bp * Hp * Op,
        transcendentals=3 * Bp * Hp,
        bytes_accessed=(Bp * Ip + Bp * Op) * 4
        + (Ip * 3 * Hp + Hp * Op) * wbytes + (4 * Hp + Op) * 4,
    )

    def build(single_buffer_weights):
        vmem_limit = min(
            64 * 1024 * 1024,
            max(32 * 1024 * 1024,
                int(1.3 * _vmem_bytes_estimate(TB, Ip, Hp, Op, wbytes, single_buffer_weights))))

        def resident(shape):
            if single_buffer_weights:
                # Constant index_map -> double-buffering buys nothing; halve weight VMEM.
                return pl.BlockSpec(shape, lambda i: (0, 0), pipeline_mode=pl.Buffered(1))
            return pl.BlockSpec(shape, lambda i: (0, 0))

        return pl.pallas_call(
            kernel,
            out_shape=jax.ShapeDtypeStruct((Bp, Op), jnp.float32),
            grid=(ntiles,),
            in_specs=[
                pl.BlockSpec((TB, Ip), lambda i: (i, 0)),        # x: streamed over batch
                resident((Ip, 3 * Hp)),                          # fused gate weights (resident)
                resident((1, 3 * Hp)),                           # fused gate bias (resident)
                resident((1, Hp)),                               # n-gate hidden bias (resident)
                resident((Hp, Op)),                              # fc weight (resident)
                resident((1, Op)),                               # fc bias (resident)
            ],
            out_specs=pl.BlockSpec((TB, Op), lambda i: (i, 0)),  # lane-dense output
            compiler_params=pltpu.CompilerParams(
                dimension_semantics=("parallel",),
                vmem_limit_bytes=vmem_limit),
            cost_estimate=cost,
        )

    args = (xp, kp["w"], kp["bg"], kp["bhn"], kp["fcw"], kp["fcb"])
    try:
        out = build(single_buffer_weights=True)(*args)
    except Exception:
        # Fallback if this JAX/Mosaic build rejects pl.Buffered(1) on pallas_call specs.
        out = build(single_buffer_weights=False)(*args)

    return out[:B, :O]


def init_params(key, input_size, hidden_size, output_size):
    """PyTorch-layout params with uniform(-1/sqrt(H), 1/sqrt(H)) init."""
    ks = jax.random.split(key, 6)
    bound = 1.0 / (hidden_size ** 0.5)
    u = lambda k, shape: jax.random.uniform(k, shape, jnp.float32, -bound, bound)
    return {
        "w_ih": u(ks[0], (3 * hidden_size, input_size)),    # weight_ih_l0
        "w_hh": u(ks[1], (3 * hidden_size, hidden_size)),   # weight_hh_l0
        "b_ih": u(ks[2], (3 * hidden_size,)),
        "b_hh": u(ks[3], (3 * hidden_size,)),
        "fc_w": u(ks[4], (output_size, hidden_size)),       # fc.weight
        "fc_b": u(ks[5], (output_size,)),
    }


def gru_forward_ref(x, params):
    """Pure-JAX reference: full GRU step (h0 = 0) + FC, PyTorch gate order (r, z, n)."""
    H = params["w_hh"].shape[1]
    B = x.shape[0]
    h = jnp.zeros((B, H), jnp.float32)
    gi = x @ params["w_ih"].T + params["b_ih"]
    gh = h @ params["w_hh"].T + params["b_hh"]
    i_r, i_z, i_n = jnp.split(gi, 3, axis=1)
    h_r, h_z, h_n = jnp.split(gh, 3, axis=1)
    r = jax.nn.sigmoid(i_r + h_r)
    z = jax.nn.sigmoid(i_z + h_z)
    n = jnp.tanh(i_n + r * h_n)
    h_new = (1.0 - z) * n + z * h
    return h_new @ params["fc_w"].T + params["fc_b"]


if __name__ == "__main__":
    batch, input_size, hidden_size, output_size = 2, 16, 32, 8

    key = jax.random.PRNGKey(0)
    k_x, k_p = jax.random.split(key)
    x = jax.random.normal(k_x, (batch, input_size), jnp.float32)
    params = init_params(k_p, input_size, hidden_size, output_size)

    ref = gru_forward_ref(x, params)

    # f32 weight path: tight check of the fused h0==0 algebra / tiling.
    out_f32 = jax.block_until_ready(gru_forward(x, params, weight_dtype=jnp.float32))
    assert out_f32.shape == (batch, output_size)
    assert jnp.allclose(out_f32, ref, atol=1e-5, rtol=1e-5), \
        f"f32 max abs err = {jnp.max(jnp.abs(out_f32 - ref))}"

    # bf16 weight path (default fast path on the MXU): looser tolerance.
    out_bf16 = jax.block_until_ready(gru_forward(x, params))
    assert out_bf16.shape == (batch, output_size)
    assert jnp.allclose(out_bf16, ref, atol=3e-2, rtol=3e-2), \
        f"bf16 max abs err = {jnp.max(jnp.abs(out_bf16 - ref))}"

    print("KERNEL_OK")
</pallas_src>

<mosaic_0001>
module attributes {stable_mosaic.version = 11 : i64} {
  func.func @gru_fc_kernel(%arg0: i32, %arg1: memref<8x16xf32, #tpu.memory_space<vmem>>, %arg2: memref<16x384xf32, #tpu.memory_space<vmem>>, %arg3: memref<1x384xf32, #tpu.memory_space<vmem>>, %arg4: memref<1x128xf32, #tpu.memory_space<vmem>>, %arg5: memref<128x128xf32, #tpu.memory_space<vmem>>, %arg6: memref<1x128xf32, #tpu.memory_space<vmem>>, %arg7: memref<8x128xf32, #tpu.memory_space<vmem>>) attributes {dimension_semantics = [#tpu.dimension_semantics<parallel>], iteration_bounds = array<i64: 1>, scalar_prefetch = 0 : i64, scratch_operands = 0 : i64, tpu.core_type = #tpu.core_type<tc>, window_params = [{transform_indices = @transform_0, window_bounds = array<i64: 8, 16>}, {pipeline_mode = #tpu.pipeline_mode<synchronous>, transform_indices = @transform_1, window_bounds = array<i64: 16, 384>}, {pipeline_mode = #tpu.pipeline_mode<synchronous>, transform_indices = @transform_2, window_bounds = array<i64: 1, 384>}, {pipeline_mode = #tpu.pipeline_mode<synchronous>, transform_indices = @transform_3, window_bounds = array<i64: 1, 128>}, {pipeline_mode = #tpu.pipeline_mode<synchronous>, transform_indices = @transform_4, window_bounds = array<i64: 128, 128>}, {pipeline_mode = #tpu.pipeline_mode<synchronous>, transform_indices = @transform_5, window_bounds = array<i64: 1, 128>}, {transform_indices = @transform_6, window_bounds = array<i64: 8, 128>}]} {
    %c0 = arith.constant 0 : index
    %c0_0 = arith.constant 0 : index
    %0 = vector.load %arg1[%c0, %c0_0] : memref<8x16xf32, #tpu.memory_space<vmem>>, vector<8x16xf32>
    %c0_1 = arith.constant 0 : index
    %c0_2 = arith.constant 0 : index
    %1 = vector.load %arg2[%c0_1, %c0_2] : memref<16x384xf32, #tpu.memory_space<vmem>>, vector<16x384xf32>
    %cst = arith.constant dense<0.000000e+00> : vector<8x384xf32>
    %2 = tpu.matmul %0, %1, %cst {dimension_numbers = #tpu.dot_dimension_numbers<[1], [0], [0], [1], [0, 0, 1, 1], [], []>} : vector<8x16xf32>, vector<16x384xf32>, vector<8x384xf32> -> vector<8x384xf32>
    %c0_3 = arith.constant 0 : index
    %c0_4 = arith.constant 0 : index
    %3 = vector.load %arg3[%c0_3, %c0_4] : memref<1x384xf32, #tpu.memory_space<vmem>>, vector<1x384xf32>
    %4 = vector.broadcast %3 : vector<1x384xf32> to vector<8x384xf32>
    %5 = arith.addf %2, %4 : vector<8x384xf32>
    %6 = vector.extract_strided_slice %5 {offsets = [0, 0], sizes = [8, 128], strides = [1, 1]} : vector<8x384xf32> to vector<8x128xf32>
    %cst_5 = arith.constant 5.000000e-01 : f32
    %7 = vector.broadcast %cst_5 : f32 to vector<8x128xf32>
    %8 = arith.mulf %7, %6 : vector<8x128xf32>
    %9 = math.tanh %8 : vector<8x128xf32>
    %cst_6 = arith.constant 5.000000e-01 : f32
    %10 = vector.broadcast %cst_6 : f32 to vector<8x128xf32>
    %11 = arith.mulf %10, %9 : vector<8x128xf32>
    %cst_7 = arith.constant 5.000000e-01 : f32
    %12 = vector.broadcast %cst_7 : f32 to vector<8x128xf32>
    %13 = arith.addf %11, %12 : vector<8x128xf32>
    %14 = vector.extract_strided_slice %5 {offsets = [0, 128], sizes = [8, 128], strides = [1, 1]} : vector<8x384xf32> to vector<8x128xf32>
    %cst_8 = arith.constant 5.000000e-01 : f32
    %15 = vector.broadcast %cst_8 : f32 to vector<8x128xf32>
    %16 = arith.mulf %15, %14 : vector<8x128xf32>
    %17 = math.tanh %16 : vector<8x128xf32>
    %cst_9 = arith.constant 5.000000e-01 : f32
    %18 = vector.broadcast %cst_9 : f32 to vector<8x128xf32>
    %19 = arith.mulf %18, %17 : vector<8x128xf32>
    %cst_10 = arith.constant 5.000000e-01 : f32
    %20 = vector.broadcast %cst_10 : f32 to vector<8x128xf32>
    %21 = arith.addf %19, %20 : vector<8x128xf32>
    %22 = vector.extract_strided_slice %5 {offsets = [0, 256], sizes = [8, 128], strides = [1, 1]} : vector<8x384xf32> to vector<8x128xf32>
    %c0_11 = arith.constant 0 : index
    %c0_12 = arith.constant 0 : index
    %23 = vector.load %arg4[%c0_11, %c0_12] : memref<1x128xf32, #tpu.memory_space<vmem>>, vector<1x128xf32>
    %24 = vector.broadcast %23 : vector<1x128xf32> to vector<8x128xf32>
    %25 = arith.mulf %13, %24 : vector<8x128xf32>
    %26 = arith.addf %22, %25 : vector<8x128xf32>
    %27 = math.tanh %26 : vector<8x128xf32>
    %28 = arith.mulf %21, %27 : vector<8x128xf32>
    %29 = arith.subf %27, %28 : vector<8x128xf32>
    %c0_13 = arith.constant 0 : index
    %c0_14 = arith.constant 0 : index
    %30 = vector.load %arg5[%c0_13, %c0_14] : memref<128x128xf32, #tpu.memory_space<vmem>>, vector<128x128xf32>
    %cst_15 = arith.constant dense<0.000000e+00> : vector<8x128xf32>
    %31 = tpu.matmul %29, %30, %cst_15 {dimension_numbers = #tpu.dot_dimension_numbers<[1], [0], [0], [1], [0, 0, 1, 1], [], []>} : vector<8x128xf32>, vector<128x128xf32>, vector<8x128xf32> -> vector<8x128xf32>
    %c0_16 = arith.constant 0 : index
    %c0_17 = arith.constant 0 : index
    %32 = vector.load %arg6[%c0_16, %c0_17] : memref<1x128xf32, #tpu.memory_space<vmem>>, vector<1x128xf32>
    %33 = vector.broadcast %32 : vector<1x128xf32> to vector<8x128xf32>
    %34 = arith.addf %31, %33 : vector<8x128xf32>
    %c0_18 = arith.constant 0 : index
    %c0_19 = arith.constant 0 : index
    %35 = vector.load %arg7[%c0_18, %c0_19] : memref<8x128xf32, #tpu.memory_space<vmem>>, vector<8x128xf32>
    tpu.vector_store %arg7[%c0_18, %c0_19], %34 {strides = array<i32>} : memref<8x128xf32, #tpu.memory_space<vmem>>, vector<8x128xf32>,
    return
  }
  func.func @transform_0(%arg0: i32) -> (i32, i32) {
    %c0_i32 = arith.constant 0 : i32
    %c0_i32_0 = arith.constant 0 : i32
    return %arg0, %c0_i32 : i32, i32
  }
  func.func @transform_1(%arg0: i32) -> (i32, i32) {
    %c0_i32 = arith.constant 0 : i32
    %c0_i32_0 = arith.constant 0 : i32
    %c0_i32_1 = arith.constant 0 : i32
    return %c0_i32, %c0_i32_0 : i32, i32
  }
  func.func @transform_2(%arg0: i32) -> (i32, i32) {
    %c0_i32 = arith.constant 0 : i32
    %c0_i32_0 = arith.constant 0 : i32
    %c0_i32_1 = arith.constant 0 : i32
    return %c0_i32, %c0_i32_0 : i32, i32
  }
  func.func @transform_3(%arg0: i32) -> (i32, i32) {
    %c0_i32 = arith.constant 0 : i32
    %c0_i32_0 = arith.constant 0 : i32
    %c0_i32_1 = arith.constant 0 : i32
    return %c0_i32, %c0_i32_0 : i32, i32
  }
  func.func @transform_4(%arg0: i32) -> (i32, i32) {
    %c0_i32 = arith.constant 0 : i32
    %c0_i32_0 = arith.constant 0 : i32
    %c0_i32_1 = arith.constant 0 : i32
    return %c0_i32, %c0_i32_0 : i32, i32
  }
  func.func @transform_5(%arg0: i32) -> (i32, i32) {
    %c0_i32 = arith.constant 0 : i32
    %c0_i32_0 = arith.constant 0 : i32
    %c0_i32_1 = arith.constant 0 : i32
    return %c0_i32, %c0_i32_0 : i32, i32
  }
  func.func @transform_6(%arg0: i32) -> (i32, i32) {
    %c0_i32 = arith.constant 0 : i32
    %c0_i32_0 = arith.constant 0 : i32
    return %arg0, %c0_i32 : i32, i32
  }
}

module attributes {stable_mosaic.version = 11 : i64} {
  func.func @gru_fc_kernel(%arg0: i32, %arg1: memref<8x16xf32, #tpu.memory_space<vmem>>, %arg2: memref<16x384xf32, #tpu.memory_space<vmem>>, %arg3: memref<1x384xf32, #tpu.memory_space<vmem>>, %arg4: memref<1x128xf32, #tpu.memory_space<vmem>>, %arg5: memref<128x128xf32, #tpu.memory_space<vmem>>, %arg6: memref<1x128xf32, #tpu.memory_space<vmem>>, %arg7: memref<8x128xf32, #tpu.memory_space<vmem>>) attributes {dimension_semantics = [#tpu.dimension_semantics<parallel>], iteration_bounds = array<i64: 1>, scalar_prefetch = 0 : i64, scratch_operands = 0 : i64, tpu.core_type = #tpu.core_type<tc>, window_params = [{transform_indices = @transform_0, window_bounds = array<i64: 8, 16>}, {pipeline_mode = #tpu.pipeline_mode<synchronous>, transform_indices = @transform_1, window_bounds = array<i64: 16, 384>}, {pipeline_mode = #tpu.pipeline_mode<synchronous>, transform_indices = @transform_2, window_bounds = array<i64: 1, 384>}, {pipeline_mode = #tpu.pipeline_mode<synchronous>, transform_indices = @transform_3, window_bounds = array<i64: 1, 128>}, {pipeline_mode = #tpu.pipeline_mode<synchronous>, transform_indices = @transform_4, window_bounds = array<i64: 128, 128>}, {pipeline_mode = #tpu.pipeline_mode<synchronous>, transform_indices = @transform_5, window_bounds = array<i64: 1, 128>}, {transform_indices = @transform_6, window_bounds = array<i64: 8, 128>}]} {
    %c0 = arith.constant 0 : index
    %c0_0 = arith.constant 0 : index
    %0 = vector.load %arg1[%c0, %c0_0] : memref<8x16xf32, #tpu.memory_space<vmem>>, vector<8x16xf32>
    %c0_1 = arith.constant 0 : index
    %c0_2 = arith.constant 0 : index
    %1 = vector.load %arg2[%c0_1, %c0_2] : memref<16x384xf32, #tpu.memory_space<vmem>>, vector<16x384xf32>
    %cst = arith.constant dense<0.000000e+00> : vector<8x384xf32>
    %2 = tpu.matmul %0, %1, %cst {dimension_numbers = #tpu.dot_dimension_numbers<[1], [0], [0], [1], [0, 0, 1, 1], [], []>} : vector<8x16xf32>, vector<16x384xf32>, vector<8x384xf32> -> vector<8x384xf32>
    %c0_3 = arith.constant 0 : index
    %c0_4 = arith.constant 0 : index
    %3 = vector.load %arg3[%c0_3, %c0_4] : memref<1x384xf32, #tpu.memory_space<vmem>>, vector<1x384xf32>
    %4 = vector.broadcast %3 : vector<1x384xf32> to vector<8x384xf32>
    %5 = arith.addf %2, %4 : vector<8x384xf32>
    %6 = vector.extract_strided_slice %5 {offsets = [0, 0], sizes = [8, 128], strides = [1, 1]} : vector<8x384xf32> to vector<8x128xf32>
    %cst_5 = arith.constant 5.000000e-01 : f32
    %7 = vector.broadcast %cst_5 : f32 to vector<8x128xf32>
    %8 = arith.mulf %7, %6 : vector<8x128xf32>
    %9 = math.tanh %8 : vector<8x128xf32>
    %cst_6 = arith.constant 5.000000e-01 : f32
    %10 = vector.broadcast %cst_6 : f32 to vector<8x128xf32>
    %11 = arith.mulf %10, %9 : vector<8x128xf32>
    %cst_7 = arith.constant 5.000000e-01 : f32
    %12 = vector.broadcast %cst_7 : f32 to vector<8x128xf32>
    %13 = arith.addf %11, %12 : vector<8x128xf32>
    %14 = vector.extract_strided_slice %5 {offsets = [0, 128], sizes = [8, 128], strides = [1, 1]} : vector<8x384xf32> to vector<8x128xf32>
    %cst_8 = arith.constant 5.000000e-01 : f32
    %15 = vector.broadcast %cst_8 : f32 to vector<8x128xf32>
    %16 = arith.mulf %15, %14 : vector<8x128xf32>
    %17 = math.tanh %16 : vector<8x128xf32>
    %cst_9 = arith.constant 5.000000e-01 : f32
    %18 = vector.broadcast %cst_9 : f32 to vector<8x128xf32>
    %19 = arith.mulf %18, %17 : vector<8x128xf32>
    %cst_10 = arith.constant 5.000000e-01 : f32
    %20 = vector.broadcast %cst_10 : f32 to vector<8x128xf32>
    %21 = arith.addf %19, %20 : vector<8x128xf32>
    %22 = vector.extract_strided_slice %5 {offsets = [0, 256], sizes = [8, 128], strides = [1, 1]} : vector<8x384xf32> to vector<8x128xf32>
    %c0_11 = arith.constant 0 : index
    %c0_12 = arith.constant 0 : index
    %23 = vector.load %arg4[%c0_11, %c0_12] : memref<1x128xf32, #tpu.memory_space<vmem>>, vector<1x128xf32>
    %24 = vector.broadcast %23 : vector<1x128xf32> to vector<8x128xf32>
    %25 = arith.mulf %13, %24 : vector<8x128xf32>
    %26 = arith.addf %22, %25 : vector<8x128xf32>
    %27 = math.tanh %26 : vector<8x128xf32>
    %28 = arith.mulf %21, %27 : vector<8x128xf32>
    %29 = arith.subf %27, %28 : vector<8x128xf32>
    %c0_13 = arith.constant 0 : index
    %c0_14 = arith.constant 0 : index
    %30 = vector.load %arg5[%c0_13, %c0_14] : memref<128x128xf32, #tpu.memory_space<vmem>>, vector<128x128xf32>
    %cst_15 = arith.constant dense<0.000000e+00> : vector<8x128xf32>
    %31 = tpu.matmul %29, %30, %cst_15 {dimension_numbers = #tpu.dot_dimension_numbers<[1], [0], [0], [1], [0, 0, 1, 1], [], []>} : vector<8x128xf32>, vector<128x128xf32>, vector<8x128xf32> -> vector<8x128xf32>
    %c0_16 = arith.constant 0 : index
    %c0_17 = arith.constant 0 : index
    %32 = vector.load %arg6[%c0_16, %c0_17] : memref<1x128xf32, #tpu.memory_space<vmem>>, vector<1x128xf32>
    %33 = vector.broadcast %32 : vector<1x128xf32> to vector<8x128xf32>
    %34 = arith.addf %31, %33 : vector<8x128xf32>
    %c0_18 = arith.constant 0 : index
    %c0_19 = arith.constant 0 : index
    %35 = vector.load %arg7[%c0_18, %c0_19] : memref<8x128xf32, #tpu.memory_space<vmem>>, vector<8x128xf32>
    tpu.vector_store %arg7[%c0_18, %c0_19], %34 {strides = array<i32>} : memref<8x128xf32, #tpu.memory_space<vmem>>, vector<8x128xf32>,
    return
  }
  func.func @transform_0(%arg0: i32) -> (i32, i32) {
    %c0_i32 = arith.constant 0 : i32
    %c0_i32_0 = arith.constant 0 : i32
    return %arg0, %c0_i32 : i32, i32
  }
  func.func @transform_1(%arg0: i32) -> (i32, i32) {
    %c0_i32 = arith.constant 0 : i32
    %c0_i32_0 = arith.constant 0 : i32
    %c0_i32_1 = arith.constant 0 : i32
    return %c0_i32, %c0_i32_0 : i32, i32
  }
  func.func @transform_2(%arg0: i32) -> (i32, i32) {
    %c0_i32 = arith.constant 0 : i32
    %c0_i32_0 = arith.constant 0 : i32
    %c0_i32_1 = arith.constant 0 : i32
    return %c0_i32, %c0_i32_0 : i32, i32
  }
  func.func @transform_3(%arg0: i32) -> (i32, i32) {
    %c0_i32 = arith.constant 0 : i32
    %c0_i32_0 = arith.constant 0 : i32
    %c0_i32_1 = arith.constant 0 : i32
    return %c0_i32, %c0_i32_0 : i32, i32
  }
  func.func @transform_4(%arg0: i32) -> (i32, i32) {
    %c0_i32 = arith.constant 0 : i32
    %c0_i32_0 = arith.constant 0 : i32
    %c0_i32_1 = arith.constant 0 : i32
    return %c0_i32, %c0_i32_0 : i32, i32
  }
  func.func @transform_5(%arg0: i32) -> (i32, i32) {
    %c0_i32 = arith.constant 0 : i32
    %c0_i32_0 = arith.constant 0 : i32
    %c0_i32_1 = arith.constant 0 : i32
    return %c0_i32, %c0_i32_0 : i32, i32
  }
  func.func @transform_6(%arg0: i32) -> (i32, i32) {
    %c0_i32 = arith.constant 0 : i32
    %c0_i32_0 = arith.constant 0 : i32
    return %arg0, %c0_i32 : i32, i32
  }
}

</mosaic_0001>

<bundles_post_ra>
// kernel: tpu_custom_call.1
= control target key start
LH: loop header
LB: loop body
LE: loop exit
PB: predicated region body
PF: predicated region fallthrough
CT: control target
= control target key end

     0   :  { %11 = vsyncpa [#allocation3], 0  ;;  %s619_s0 = inlined_call_operand.hbm [shape: f32[8,16], index: 0, kind: input, shape index: {}]   ;;  %s620_s1 = inlined_call_operand.hbm [shape: f32[16,384], index: 1, kind: input, shape index: {}]   ;;  %s621_s2 = inlined_call_operand.vmem [shape: f32[1,384], index: 2, kind: input, shape index: {}]   ;;  %s622_s3 = inlined_call_operand.vmem [shape: f32[1,128], index: 3, kind: input, shape index: {}]   ;;  %s623_s4 = inlined_call_operand.hbm [shape: f32[128,128], index: 4, kind: input, shape index: {}]   ;;  %s624_s5 = inlined_call_operand.vmem [shape: f32[1,128], index: 5, kind: input, shape index: {}]   ;;  %s625_s6 = inlined_call_operand.hbm [shape: f32[8,128], index: 6, kind: output, shape index: {}]  }
   0x1   :  { %12 = vsyncpa [#allocation6], 0 }
   0x2   :  { %13 = vsyncpa [#allocation4], 0  ;;  %s530_s21 = smov [#allocation5]  }
   0x3   :  { %s29_s22 = sshll.u32 %s530_s21, 4  ;;  %s30_s22 = int_to_ptr.vmem [resolvable:$true] %s29_s22 }
   0x4   :  { %s452_s23 = scalar_lea.vmem %s30_s22, 768  ;;  %p457_p1 = scmp.lt.s32.totalorder %s30_s22, %s30_s22 }
   0x5   :  { %p453_p0 = scmp.ne.s32.totalorder %s30_s22, %s452_s23  ;;  %p458_p2 = scmp.lt.s32.totalorder %s452_s23, %s452_s23 }
   0x7   :  { %p459_p3 = por %p458_p2, %p457_p1 }
   0x9   :  { %p460_p4 = pnand %p459_p3, %p453_p0 }
   0xb   :  { %463 = shalt.err (!%p460_p4)
}
   0xc   :  { %s531_s24 = smov 384   ;;  %s532_s25 = smov 24  }
   0xd   :  { %35 = dma.hbm_to_vmem [thread:$0]  %s620_s1, 768, %s30_s22, [#allocation6], %s531_s24, %s531_s24, %s532_s25  }
   0xe   :  { %s533_s28 = smov [#allocation2]   ;;  %s534_s30 = smov [#allocation7]  }
   0xf   :  { %s20_s29 = sshll.u32 %s533_s28, 4  ;;  %s45_s7 = sshll.u32 %s534_s30, 4  ;;  %s21_s29 = int_to_ptr.vmem [resolvable:$true] %s20_s29  ;;  %s46_s7 = int_to_ptr.vmem [resolvable:$true] %s45_s7 }
  0x10   :  { %s472_s8 = scalar_lea.vmem %s21_s29, 128  ;;  %p477_p6 = scmp.lt.s32.totalorder %s21_s29, %s21_s29 }
  0x11   :  { %p473_p5 = scmp.ne.s32.totalorder %s21_s29, %s472_s8  ;;  %p478_p7 = scmp.lt.s32.totalorder %s472_s8, %s472_s8 }
  0x13   :  { %p479_p8 = por %p478_p7, %p477_p6 }
  0x15   :  { %p480_p9 = pnand %p479_p8, %p473_p5 }
  0x17   :  { %483 = shalt.err (!%p480_p9)
}
  0x18   :  { %23 = dma.hbm_to_vmem [thread:$0]  %s619_s0, 128, %s21_s29, [#allocation3]  }
  0x19   :  { %s492_s11 = scalar_lea.vmem %s46_s7, 2048  ;;  %p497_p11 = scmp.lt.s32.totalorder %s46_s7, %s46_s7 }
  0x1a   :  { %p493_p10 = scmp.ne.s32.totalorder %s46_s7, %s492_s11  ;;  %p498_p12 = scmp.lt.s32.totalorder %s492_s11, %s492_s11 }
  0x1c   :  { %p499_p13 = por %p498_p12, %p497_p11 }
  0x1e   :  { %p500_p0 = pnand %p499_p13, %p493_p10 }
  0x20   :  { %503 = shalt.err (!%p500_p0)
}
  0x21   :  { %s535_s1 = smov 128   ;;  %s536_s12 = smov 8  }
  0x22   :  { %51 = dma.hbm_to_vmem [thread:$0]  %s623_s4, 2048, %s46_s7, [#allocation6], %s535_s1, %s535_s1, %s536_s12  }
  0x23   :  { %524 = dma.done.wait [#allocation3], 128  }
  0x24   :  { %525 = vsyncadd [#allocation3], 4294967168 }
  0x25   :  { %526 = dma.done.wait [#allocation6], 2816  }
  0x26   :  { %527 = vsyncadd [#allocation6], 4294964480  ;;  %v537_v0 = vmov 0.0   ;;  %vm538_vm0 = vmmov 0   ;;  %v68_v1 = vld [vmem:[#allocation5 + $0x20] sm:$0xff]  ;;  %v67_v2 = vld [vmem:[#allocation5 + $0x18] sm:$0xff]  ;;  %v72_v24 = vlaneseq }
  0x27   :  { %155 = vmatprep.mubr.f32.mxu1 %v537_v0  ;;  %393 = vmatprep.subr.mxu0 %v537_v0  ;;  %v65_v3 = vld [vmem:[#allocation5 + $0x8] sm:$0xff]  ;;  %v64_v4 = vld [vmem:[#allocation5] sm:$0xff]  ;;  %v63_v5 = vld [vmem:[#allocation2] sm:$0xff]  ;;  %vm87_vm1 = vcmask 130048   ;;  %s539_s18 = smov [#allocation8]  }
  0x28   :  { %425 = vmatprep.mubr.msk.f32.mxu0 %vm538_vm0, %v537_v0  ;;  %119 = vmatprep.subr.mxu1 %v68_v1  ;;  %v69_v6 = vld [vmem:[#allocation5 + $0x28] sm:$0xff]  ;;  %v66_v7 = vld [vmem:[#allocation5 + $0x10] sm:$0xff]  ;;  %v266_v9 = vld [vmem:[#allocation7 + $0x70] sm:$0xff]  ;;  %v73_v25 = vshrl.u32 %v72_v24, 7  ;;  %s352_s19 = sshll.u32 %s539_s18, 4  ;;  %s353_s19 = int_to_ptr.vmem [resolvable:$true] %s352_s19 }
  0x29   :  { %120 = vmatpush1.msra.mxu1 %v67_v2  ;;  %v267_v8 = vld [vmem:[#allocation7 + $0x78] sm:$0xff]  ;;  %v265_v10 = vld [vmem:[#allocation7 + $0x68] sm:$0xff]  ;;  %v264_v11 = vld [vmem:[#allocation7 + $0x60] sm:$0xff]  ;;  %p509_p2 = scmp.lt.s32.totalorder %s353_s19, %s353_s19 }
  0x2a   :  { %121 = vmatprep.subr.mxu1 %v65_v3  ;;  %394 = vmatpush3.msra.mxu0 %v267_v8  ;;  %v263_v12 = vld [vmem:[#allocation7 + $0x58] sm:$0xff]  ;;  %v262_v13 = vld [vmem:[#allocation7 + $0x50] sm:$0xff]  ;;  %v261_v14 = vld [vmem:[#allocation7 + $0x48] sm:$0xff]  ;;  %v74_v26 = vsub.s32 0, %v73_v25  ;;  %v78_v33 = vsub.s32 1, %v73_v25  ;;  %v82_v38 = vsub.s32 2, %v73_v25 }
  0x2b   :  { %122 = vmatpush1.msra.mxu1 %v64_v4  ;;  %395 = vmatprep.subr.mxu0 %v537_v0  ;;  %v260_v15 = vld [vmem:[#allocation7 + $0x40] sm:$0xff]  ;;  %v259_v16 = vld [vmem:[#allocation7 + $0x38] sm:$0xff]  ;;  %v258_v17 = vld [vmem:[#allocation7 + $0x30] sm:$0xff] }
  0x2c   :  { %362 = vmatmul.mubr.msk.f32.vlgmr.msra.gmra.mxu1 %vm87_vm1, %v63_v5  ;;  %386 = vmatprep.subr.mxu1 %v537_v0  ;;  %v257_v18 = vld [vmem:[#allocation7 + $0x28] sm:$0xff]  ;;  %v256_v19 = vld [vmem:[#allocation7 + $0x20] sm:$0xff]  ;;  %v255_v20 = vld [vmem:[#allocation7 + $0x18] sm:$0xff] }
  0x2d   :  { %387 = vmatpush3.msra.mxu1 %v69_v6  ;;  %390 = vmatprep.mubr.msk.f32.mxu1 %vm538_vm0, %v537_v0  ;;  %v254_v21 = vld [vmem:[#allocation7 + $0x10] sm:$0xff]  ;;  %v253_v22 = vld [vmem:[#allocation7 + $0x8] sm:$0xff]  ;;  %v252_v23 = vld [vmem:[#allocation7] sm:$0xff] }
  0x2e   :  { %388 = vmatprep.subr.mxu1 %v537_v0  ;;  %396 = vmatpush3.msra.mxu0 %v266_v9  ;;  %v70_v27 = vld [vmem:[%s621_s2] sm:$0x7] }
  0x2f   :  { %389 = vmatpush3.msra.mxu1 %v66_v7  ;;  %397 = vmatprep.subr.mxu0 %v537_v0  ;;  %v75_v28 = vrot.slane %v70_v27, %v74_v26  ;;  %v79_v36 = vrot.slane %v70_v27, %v78_v33  ;;  %v83_v40 = vrot.slane %v70_v27, %v82_v38  ;;  %v364_v43 = vld [vmem:[%s622_s3] ss:$0 sm:$0xff]  ;;  %s504_s3 = scalar_lea.vmem %s353_s19, 128 }
  0x30   :  { %391 = vmatmul.mubr.msk.f32.vlgmr.msra.gmra.mxu1 %vm87_vm1, %v63_v5  ;;  %398 = vmatpush3.msra.mxu0 %v265_v10  ;;  %v365_v54 = vld [vmem:[%s624_s5] ss:$0 sm:$0xff]  ;;  %p505_p1 = scmp.ne.s32.totalorder %s353_s19, %s504_s3  ;;  %p510_p3 = scmp.lt.s32.totalorder %s504_s3, %s504_s3 }
  0x31   :  { %399 = vmatprep.subr.mxu0 %v537_v0 }
  0x32   :  { %400 = vmatpush3.msra.mxu0 %v264_v11  ;;  %p511_p4 = por %p510_p3, %p509_p2 }
  0x33   :  { %401 = vmatprep.subr.mxu0 %v537_v0 }
  0x34   :  { %402 = vmatpush3.msra.mxu0 %v263_v12  ;;  %p512_p5 = pnand %p511_p4, %p505_p1 }
  0x35   :  { %403 = vmatprep.subr.mxu0 %v537_v0 }
  0x36   :  { %404 = vmatpush3.msra.mxu0 %v262_v13 }
  0x37   :  { %405 = vmatprep.subr.mxu0 %v537_v0 }
  0x38   :  { %406 = vmatpush3.msra.mxu0 %v261_v14 }
  0x39   :  { %407 = vmatprep.subr.mxu0 %v537_v0 }
  0x3a   :  { %408 = vmatpush3.msra.mxu0 %v260_v15 }
  0x3b   :  { %409 = vmatprep.subr.mxu0 %v537_v0 }
  0x3c   :  { %410 = vmatpush3.msra.mxu0 %v259_v16 }
  0x3d   :  { %411 = vmatprep.subr.mxu0 %v537_v0 }
  0x3e   :  { %412 = vmatpush3.msra.mxu0 %v258_v17 }
  0x3f   :  { %413 = vmatprep.subr.mxu0 %v537_v0 }
  0x40   :  { %414 = vmatpush3.msra.mxu0 %v257_v18 }
  0x41   :  { %415 = vmatprep.subr.mxu0 %v537_v0 }
  0x42   :  { %416 = vmatpush3.msra.mxu0 %v256_v19 }
  0x43   :  { %417 = vmatprep.subr.mxu0 %v537_v0 }
  0x44   :  { %418 = vmatpush3.msra.mxu0 %v255_v20 }
  0x45   :  { %419 = vmatprep.subr.mxu0 %v537_v0 }
  0x46   :  { %420 = vmatpush3.msra.mxu0 %v254_v21 }
  0x47   :  { %421 = vmatprep.subr.mxu0 %v537_v0 }
  0x48   :  { %422 = vmatpush3.msra.mxu0 %v253_v22 }
  0x49   :  { %423 = vmatprep.subr.mxu0 %v537_v0 }
  0x4a   :  { %424 = vmatpush3.msra.mxu0 %v252_v23 }
  0xec   :  { %v157_v29 = vpop.f32.mrf.mxu1 }
  0xed   :  { %v158_v30 = vadd.f32 %v157_v29, %v75_v28 }
  0xee   :  { %v159_v31 = vpop.f32.mrf.mxu1 }
  0xef   :  { %v232_v32 = vmul.f32 0.5, %v158_v30  ;;  %v160_v37 = vadd.f32 %v159_v31, %v79_v36 }
  0xf0   :  { %v228_v34 = vpop.f32.mrf.mxu1 }
  0xf1   :  { %438 = vtanh.f32 %v232_v32  ;;  %v236_v39 = vmul.f32 0.5, %v160_v37  ;;  %v229_v45 = vadd.f32 %v228_v34, %v83_v40 }
  0xf2   :  { %v392_v35 = vpop.f32.mrf.mxu1 }
  0xf3   :  { %440 = vtanh.f32 %v236_v39 }
  0xfe   :  { %v439_v41 = vpop.eup %438 }
  0xff   :  { %v234_v42 = vmul.f32 0.5, %v439_v41 }
 0x100   :  { %v441_v48 = vpop.eup %440 }
 0x101   :  { %v235_v44 = vadd.f32 0.5, %v234_v42  ;;  %v238_v49 = vmul.f32 0.5, %v441_v48 }
 0x103   :  { %v247_v46 = vmul.f32 %v364_v43, %v235_v44  ;;  %v239_v50 = vadd.f32 0.5, %v238_v49 }
 0x105   :  { %v248_v47 = vadd.f32 %v247_v46, %v229_v45 }
 0x107   :  { %442 = vtanh.f32 %v248_v47 }
 0x114   :  { %v443_v51 = vpop.eup %442 }
 0x115   :  { %v250_v52 = vmul.f32 %v443_v51, %v239_v50 }
 0x117   :  { %v251_v53 = vsub.f32 %v443_v51, %v250_v52 }
 0x119   :  { %426 = vmatmul.mubr.f32.vlgmr.msra.gmra.mxu0 %v251_v53 }
 0x1d9   :  { %v341_v55 = vpop.f32.mrf.mxu0 }
 0x1da   :  { %v342_v56 = vadd.f32 %v365_v54, %v341_v55 }
 0x1db   :  { %v427_v57 = vpop.f32.mrf.mxu0 }
 0x1dc   :  { %345 = vst [vmem:[#allocation8] sm:$0xff] %v342_v56 }
 0x1dd   :  { %515 = shalt.err (!%p512_p5)
}
 0x1de   :  { %355 = dma.vmem_to_hbm [thread:$0]  %s353_s19, 128, %s625_s6, [#allocation4]  }
 0x1df   :  { %528 = dma.done.wait [#allocation4], 128  }
 0x1e0   :  { %529 = vsyncadd [#allocation4], 4294967168 }
 0x1e1   :  { %359 = vsyncpa [#allocation3], 1 }
 0x1e2   :  { %360 = vsyncpa [#allocation6], 1 }
 0x1e3   :  { %361 = vsyncpa [#allocation4], 1 }

// kernel: tpu_custom_call.1
= control target key start
LH: loop header
LB: loop body
LE: loop exit
PB: predicated region body
PF: predicated region fallthrough
CT: control target
= control target key end

     0   :  { %11 = vsyncpa [#allocation3], 0  ;;  %s619_s0 = inlined_call_operand.hbm [shape: f32[8,16], index: 0, kind: input, shape index: {}]   ;;  %s620_s1 = inlined_call_operand.hbm [shape: f32[16,384], index: 1, kind: input, shape index: {}]   ;;  %s621_s2 = inlined_call_operand.vmem [shape: f32[1,384], index: 2, kind: input, shape index: {}]   ;;  %s622_s3 = inlined_call_operand.vmem [shape: f32[1,128], index: 3, kind: input, shape index: {}]   ;;  %s623_s4 = inlined_call_operand.hbm [shape: f32[128,128], index: 4, kind: input, shape index: {}]   ;;  %s624_s5 = inlined_call_operand.vmem [shape: f32[1,128], index: 5, kind: input, shape index: {}]   ;;  %s625_s6 = inlined_call_operand.hbm [shape: f32[8,128], index: 6, kind: output, shape index: {}]  }
   0x1   :  { %12 = vsyncpa [#allocation6], 0 }
   0x2   :  { %13 = vsyncpa [#allocation4], 0  ;;  %s530_s21 = smov [#allocation5]  }
   0x3   :  { %s29_s22 = sshll.u32 %s530_s21, 4  ;;  %s30_s22 = int_to_ptr.vmem [resolvable:$true] %s29_s22 }
   0x4   :  { %s452_s23 = scalar_lea.vmem %s30_s22, 768  ;;  %p457_p1 = scmp.lt.s32.totalorder %s30_s22, %s30_s22 }
   0x5   :  { %p453_p0 = scmp.ne.s32.totalorder %s30_s22, %s452_s23  ;;  %p458_p2 = scmp.lt.s32.totalorder %s452_s23, %s452_s23 }
   0x7   :  { %p459_p3 = por %p458_p2, %p457_p1 }
   0x9   :  { %p460_p4 = pnand %p459_p3, %p453_p0 }
   0xb   :  { %463 = shalt.err (!%p460_p4)
}
   0xc   :  { %s531_s24 = smov 384   ;;  %s532_s25 = smov 24  }
   0xd   :  { %35 = dma.hbm_to_vmem [thread:$0]  %s620_s1, 768, %s30_s22, [#allocation6], %s531_s24, %s531_s24, %s532_s25  }
   0xe   :  { %s533_s28 = smov [#allocation2]   ;;  %s534_s30 = smov [#allocation7]  }
   0xf   :  { %s20_s29 = sshll.u32 %s533_s28, 4  ;;  %s45_s7 = sshll.u32 %s534_s30, 4  ;;  %s21_s29 = int_to_ptr.vmem [resolvable:$true] %s20_s29  ;;  %s46_s7 = int_to_ptr.vmem [resolvable:$true] %s45_s7 }
  0x10   :  { %s472_s8 = scalar_lea.vmem %s21_s29, 128  ;;  %p477_p6 = scmp.lt.s32.totalorder %s21_s29, %s21_s29 }
  0x11   :  { %p473_p5 = scmp.ne.s32.totalorder %s21_s29, %s472_s8  ;;  %p478_p7 = scmp.lt.s32.totalorder %s472_s8, %s472_s8 }
  0x13   :  { %p479_p8 = por %p478_p7, %p477_p6 }
  0x15   :  { %p480_p9 = pnand %p479_p8, %p473_p5 }
  0x17   :  { %483 = shalt.err (!%p480_p9)
}
  0x18   :  { %23 = dma.hbm_to_vmem [thread:$0]  %s619_s0, 128, %s21_s29, [#allocation3]  }
  0x19   :  { %s492_s11 = scalar_lea.vmem %s46_s7, 2048  ;;  %p497_p11 = scmp.lt.s32.totalorder %s46_s7, %s46_s7 }
  0x1a   :  { %p493_p10 = scmp.ne.s32.totalorder %s46_s7, %s492_s11  ;;  %p498_p12 = scmp.lt.s32.totalorder %s492_s11, %s492_s11 }
  0x1c   :  { %p499_p13 = por %p498_p12, %p497_p11 }
  0x1e   :  { %p500_p0 = pnand %p499_p13, %p493_p10 }
  0x20   :  { %503 = shalt.err (!%p500_p0)
}
  0x21   :  { %s535_s1 = smov 128   ;;  %s536_s12 = smov 8  }
  0x22   :  { %51 = dma.hbm_to_vmem [thread:$0]  %s623_s4, 2048, %s46_s7, [#allocation6], %s535_s1, %s535_s1, %s536_s12  }
  0x23   :  { %524 = dma.done.wait [#allocation3], 128  }
  0x24   :  { %525 = vsyncadd [#allocation3], 4294967168 }
  0x25   :  { %526 = dma.done.wait [#allocation6], 2816  }
  0x26   :  { %527 = vsyncadd [#allocation6], 4294964480  ;;  %v537_v0 = vmov 0.0   ;;  %vm538_vm0 = vmmov 0   ;;  %v68_v1 = vld [vmem:[#allocation5 + $0x20] sm:$0xff]  ;;  %v67_v2 = vld [vmem:[#allocation5 + $0x18] sm:$0xff]  ;;  %v72_v24 = vlaneseq }
  0x27   :  { %155 = vmatprep.mubr.f32.mxu1 %v537_v0  ;;  %393 = vmatprep.subr.mxu0 %v537_v0  ;;  %v65_v3 = vld [vmem:[#allocation5 + $0x8] sm:$0xff]  ;;  %v64_v4 = vld [vmem:[#allocation5] sm:$0xff]  ;;  %v63_v5 = vld [vmem:[#allocation2] sm:$0xff]  ;;  %vm87_vm1 = vcmask 130048   ;;  %s539_s18 = smov [#allocation8]  }
  0x28   :  { %425 = vmatprep.mubr.msk.f32.mxu0 %vm538_vm0, %v537_v0  ;;  %119 = vmatprep.subr.mxu1 %v68_v1  ;;  %v69_v6 = vld [vmem:[#allocation5 + $0x28] sm:$0xff]  ;;  %v66_v7 = vld [vmem:[#allocation5 + $0x10] sm:$0xff]  ;;  %v266_v9 = vld [vmem:[#allocation7 + $0x70] sm:$0xff]  ;;  %v73_v25 = vshrl.u32 %v72_v24, 7  ;;  %s352_s19 = sshll.u32 %s539_s18, 4  ;;  %s353_s19 = int_to_ptr.vmem [resolvable:$true] %s352_s19 }
  0x29   :  { %120 = vmatpush1.msra.mxu1 %v67_v2  ;;  %v267_v8 = vld [vmem:[#allocation7 + $0x78] sm:$0xff]  ;;  %v265_v10 = vld [vmem:[#allocation7 + $0x68] sm:$0xff]  ;;  %v264_v11 = vld [vmem:[#allocation7 + $0x60] sm:$0xff]  ;;  %p509_p2 = scmp.lt.s32.totalorder %s353_s19, %s353_s19 }
  0x2a   :  { %121 = vmatprep.subr.mxu1 %v65_v3  ;;  %394 = vmatpush3.msra.mxu0 %v267_v8  ;;  %v263_v12 = vld [vmem:[#allocation7 + $0x58] sm:$0xff]  ;;  %v262_v13 = vld [vmem:[#allocation7 + $0x50] sm:$0xff]  ;;  %v261_v14 = vld [vmem:[#allocation7 + $0x48] sm:$0xff]  ;;  %v74_v26 = vsub.s32 0, %v73_v25  ;;  %v78_v33 = vsub.s32 1, %v73_v25  ;;  %v82_v38 = vsub.s32 2, %v73_v25 }
  0x2b   :  { %122 = vmatpush1.msra.mxu1 %v64_v4  ;;  %395 = vmatprep.subr.mxu0 %v537_v0  ;;  %v260_v15 = vld [vmem:[#allocation7 + $0x40] sm:$0xff]  ;;  %v259_v16 = vld [vmem:[#allocation7 + $0x38] sm:$0xff]  ;;  %v258_v17 = vld [vmem:[#allocation7 + $0x30] sm:$0xff] }
  0x2c   :  { %362 = vmatmul.mubr.msk.f32.vlgmr.msra.gmra.mxu1 %vm87_vm1, %v63_v5  ;;  %386 = vmatprep.subr.mxu1 %v537_v0  ;;  %v257_v18 = vld [vmem:[#allocation7 + $0x28] sm:$0xff]  ;;  %v256_v19 = vld [vmem:[#allocation7 + $0x20] sm:$0xff]  ;;  %v255_v20 = vld [vmem:[#allocation7 + $0x18] sm:$0xff] }
  0x2d   :  { %387 = vmatpush3.msra.mxu1 %v69_v6  ;;  %390 = vmatprep.mubr.msk.f32.mxu1 %vm538_vm0, %v537_v0  ;;  %v254_v21 = vld [vmem:[#allocation7 + $0x10] sm:$0xff]  ;;  %v253_v22 = vld [vmem:[#allocation7 + $0x8] sm:$0xff]  ;;  %v252_v23 = vld [vmem:[#allocation7] sm:$0xff] }
  0x2e   :  { %388 = vmatprep.subr.mxu1 %v537_v0  ;;  %396 = vmatpush3.msra.mxu0 %v266_v9  ;;  %v70_v27 = vld [vmem:[%s621_s2] sm:$0x7] }
  0x2f   :  { %389 = vmatpush3.msra.mxu1 %v66_v7  ;;  %397 = vmatprep.subr.mxu0 %v537_v0  ;;  %v75_v28 = vrot.slane %v70_v27, %v74_v26  ;;  %v79_v36 = vrot.slane %v70_v27, %v78_v33  ;;  %v83_v40 = vrot.slane %v70_v27, %v82_v38  ;;  %v364_v43 = vld [vmem:[%s622_s3] ss:$0 sm:$0xff]  ;;  %s504_s3 = scalar_lea.vmem %s353_s19, 128 }
  0x30   :  { %391 = vmatmul.mubr.msk.f32.vlgmr.msra.gmra.mxu1 %vm87_vm1, %v63_v5  ;;  %398 = vmatpush3.msra.mxu0 %v265_v10  ;;  %v365_v54 = vld [vmem:[%s624_s5] ss:$0 sm:$0xff]  ;;  %p505_p1 = scmp.ne.s32.totalorder %s353_s19, %s504_s3  ;;  %p510_p3 = scmp.lt.s32.totalorder %s504_s3, %s504_s3 }
  0x31   :  { %399 = vmatprep.subr.mxu0 %v537_v0 }
  0x32   :  { %400 = vmatpush3.msra.mxu0 %v264_v11  ;;  %p511_p4 = por %p510_p3, %p509_p2 }
  0x33   :  { %401 = vmatprep.subr.mxu0 %v537_v0 }
  0x34   :  { %402 = vmatpush3.msra.mxu0 %v263_v12  ;;  %p512_p5 = pnand %p511_p4, %p505_p1 }
  0x35   :  { %403 = vmatprep.subr.mxu0 %v537_v0 }
  0x36   :  { %404 = vmatpush3.msra.mxu0 %v262_v13 }
  0x37   :  { %405 = vmatprep.subr.mxu0 %v537_v0 }
  0x38   :  { %406 = vmatpush3.msra.mxu0 %v261_v14 }
  0x39   :  { %407 = vmatprep.subr.mxu0 %v537_v0 }
  0x3a   :  { %408 = vmatpush3.msra.mxu0 %v260_v15 }
  0x3b   :  { %409 = vmatprep.subr.mxu0 %v537_v0 }
  0x3c   :  { %410 = vmatpush3.msra.mxu0 %v259_v16 }
  0x3d   :  { %411 = vmatprep.subr.mxu0 %v537_v0 }
  0x3e   :  { %412 = vmatpush3.msra.mxu0 %v258_v17 }
  0x3f   :  { %413 = vmatprep.subr.mxu0 %v537_v0 }
  0x40   :  { %414 = vmatpush3.msra.mxu0 %v257_v18 }
  0x41   :  { %415 = vmatprep.subr.mxu0 %v537_v0 }
  0x42   :  { %416 = vmatpush3.msra.mxu0 %v256_v19 }
  0x43   :  { %417 = vmatprep.subr.mxu0 %v537_v0 }
  0x44   :  { %418 = vmatpush3.msra.mxu0 %v255_v20 }
  0x45   :  { %419 = vmatprep.subr.mxu0 %v537_v0 }
  0x46   :  { %420 = vmatpush3.msra.mxu0 %v254_v21 }
  0x47   :  { %421 = vmatprep.subr.mxu0 %v537_v0 }
  0x48   :  { %422 = vmatpush3.msra.mxu0 %v253_v22 }
  0x49   :  { %423 = vmatprep.subr.mxu0 %v537_v0 }
  0x4a   :  { %424 = vmatpush3.msra.mxu0 %v252_v23 }
  0xec   :  { %v157_v29 = vpop.f32.mrf.mxu1 }
  0xed   :  { %v158_v30 = vadd.f32 %v157_v29, %v75_v28 }
  0xee   :  { %v159_v31 = vpop.f32.mrf.mxu1 }
  0xef   :  { %v232_v32 = vmul.f32 0.5, %v158_v30  ;;  %v160_v37 = vadd.f32 %v159_v31, %v79_v36 }
  0xf0   :  { %v228_v34 = vpop.f32.mrf.mxu1 }
  0xf1   :  { %438 = vtanh.f32 %v232_v32  ;;  %v236_v39 = vmul.f32 0.5, %v160_v37  ;;  %v229_v45 = vadd.f32 %v228_v34, %v83_v40 }
  0xf2   :  { %v392_v35 = vpop.f32.mrf.mxu1 }
  0xf3   :  { %440 = vtanh.f32 %v236_v39 }
  0xfe   :  { %v439_v41 = vpop.eup %438 }
  0xff   :  { %v234_v42 = vmul.f32 0.5, %v439_v41 }
 0x100   :  { %v441_v48 = vpop.eup %440 }
 0x101   :  { %v235_v44 = vadd.f32 0.5, %v234_v42  ;;  %v238_v49 = vmul.f32 0.5, %v441_v48 }
 0x103   :  { %v247_v46 = vmul.f32 %v364_v43, %v235_v44  ;;  %v239_v50 = vadd.f32 0.5, %v238_v49 }
 0x105   :  { %v248_v47 = vadd.f32 %v247_v46, %v229_v45 }
 0x107   :  { %442 = vtanh.f32 %v248_v47 }
 0x114   :  { %v443_v51 = vpop.eup %442 }
 0x115   :  { %v250_v52 = vmul.f32 %v443_v51, %v239_v50 }
 0x117   :  { %v251_v53 = vsub.f32 %v443_v51, %v250_v52 }
 0x119   :  { %426 = vmatmul.mubr.f32.vlgmr.msra.gmra.mxu0 %v251_v53 }
 0x1d9   :  { %v341_v55 = vpop.f32.mrf.mxu0 }
 0x1da   :  { %v342_v56 = vadd.f32 %v365_v54, %v341_v55 }
 0x1db   :  { %v427_v57 = vpop.f32.mrf.mxu0 }
 0x1dc   :  { %345 = vst [vmem:[#allocation8] sm:$0xff] %v342_v56 }
 0x1dd   :  { %515 = shalt.err (!%p512_p5)
}
 0x1de   :  { %355 = dma.vmem_to_hbm [thread:$0]  %s353_s19, 128, %s625_s6, [#allocation4]  }
 0x1df   :  { %528 = dma.done.wait [#allocation4], 128  }
 0x1e0   :  { %529 = vsyncadd [#allocation4], 4294967168 }
 0x1e1   :  { %359 = vsyncpa [#allocation3], 1 }
 0x1e2   :  { %360 = vsyncpa [#allocation6], 1 }
 0x1e3   :  { %361 = vsyncpa [#allocation4], 1 }

</bundles_post_ra>
